<compile_context>
chip_gen: v5e
topology: v5e:2x2
jax: 0.10.0
libtpu: 0.0.40
codegen_flags: <defaults>
</compile_context>

<pallas_src>
import jax
import jax.numpy as jnp
from jax.experimental import pallas as pl
from jax.experimental.pallas import tpu as pltpu


# ----------------------------- Pallas kernel -------------------------------

def _rotary_cos_sin_kernel(pos_ref, inv_ref, cos_ref, sin_ref):
    # pos_ref: (1, ts, 1) f32 positions for this (batch, seq-tile) grid point.
    # inv_ref: (1, dim)   f32 inverse frequencies, already duplicated to `dim`.
    pos = pos_ref[...]                       # (1, ts, 1)
    inv = inv_ref[...]                       # (1, dim)
    emb = pos * inv[:, None, :]              # (1, ts, dim), f32 — no concat needed
    cos_ref[...] = jnp.cos(emb).astype(cos_ref.dtype)
    sin_ref[...] = jnp.sin(emb).astype(sin_ref.dtype)


def _pick_seq_tile(seq_len, max_tile=512):
    """Largest multiple-of-8 divisor of seq_len that is <= max_tile (else full)."""
    if seq_len <= max_tile:
        return seq_len
    t = max_tile - (max_tile % 8)
    while t >= 8:
        if seq_len % t == 0:
            return t
        t -= 8
    return seq_len


def rotary_cos_sin_pallas(position_ids, inv_freq_full, out_dtype, max_tile=512):
    """position_ids: (B, S) ints; inv_freq_full: (1, dim) f32.

    Returns (cos, sin), each (B, S, dim) in `out_dtype`.
    """
    B, S = position_ids.shape
    dim = inv_freq_full.shape[-1]
    ts = _pick_seq_tile(S, max_tile)
    grid = (B, S // ts)

    # Pre-cast positions to f32 (matches position_ids.float() in torch) and add
    # a trailing unit dim so the block's last two dims are layout-friendly.
    pos_f = position_ids.astype(jnp.float32).reshape(B, S, 1)

    out_shape = (
        jax.ShapeDtypeStruct((B, S, dim), out_dtype),
        jax.ShapeDtypeStruct((B, S, dim), out_dtype),
    )
    out_block = pl.BlockSpec((1, ts, dim), lambda b, s: (b, s, 0))

    return pl.pallas_call(
        _rotary_cos_sin_kernel,
        out_shape=out_shape,
        grid=grid,
        in_specs=[
            pl.BlockSpec((1, ts, 1), lambda b, s: (b, s, 0)),   # positions tile
            pl.BlockSpec((1, dim), lambda b, s: (0, 0)),        # inv_freq (reused)
        ],
        out_specs=(out_block, out_block),
        compiler_params=pltpu.CompilerParams(
            dimension_semantics=("parallel", "parallel")
        ),
    )(pos_f, inv_freq_full)


# ----------------------------- Module wrapper ------------------------------

class GemmaRotaryEmbeddingPallas:
    def __init__(self, dim, max_position_embeddings=2048, base=10000):
        self.dim = dim
        self.max_position_embeddings = max_position_embeddings
        self.base = float(base)
        half_exp = jnp.arange(0, dim, 2, dtype=jnp.float32) / dim
        inv_freq = 1.0 / (self.base ** half_exp)                 # (dim // 2,)
        # Static buffer (like register_buffer).  Duplicating it means the
        # kernel's `pos * inv_full` equals cat([freqs, freqs], -1) exactly
        # (same f32 products), with no in-kernel cross-lane concatenate.
        self.inv_freq_full = jnp.concatenate([inv_freq, inv_freq])[None, :]  # (1, dim)

    def __call__(self, x, position_ids, seq_len=None):
        # seq_len accepted for API parity with the PyTorch module; unused there too.
        del seq_len
        # TODO(synk): torch.autocast / .to(device) bookkeeping has no JAX
        # equivalent; the kernel always computes in f32 and casts to x.dtype.
        return rotary_cos_sin_pallas(position_ids, self.inv_freq_full, x.dtype)


# ----------------------------- Pure-JAX reference ---------------------------

def reference_rotary(dim, base, x, position_ids):
    """Mirrors the PyTorch forward exactly (f32 math, cast to x.dtype)."""
    inv_freq = 1.0 / (base ** (jnp.arange(0, dim, 2, dtype=jnp.float32) / dim))
    inv_freq_expanded = jnp.broadcast_to(
        inv_freq[None, :, None], (position_ids.shape[0], dim // 2, 1))
    position_ids_expanded = position_ids[:, None, :].astype(jnp.float32)
    freqs = jnp.matmul(inv_freq_expanded, position_ids_expanded).transpose(0, 2, 1)
    emb = jnp.concatenate([freqs, freqs], axis=-1)
    return jnp.cos(emb).astype(x.dtype), jnp.sin(emb).astype(x.dtype)


# ----------------------------------- main -----------------------------------

if __name__ == "__main__":
    # Small deterministic test consistent with the module's forward signature.
    B, S, HIDDEN, DIM = 2, 8, 32, 16
    key = jax.random.PRNGKey(0)
    x = jax.random.normal(key, (B, S, HIDDEN), jnp.float32)          # only dtype is used
    position_ids = jnp.broadcast_to(
        jnp.arange(S, dtype=jnp.int32)[None, :], (B, S))

    rope = GemmaRotaryEmbeddingPallas(DIM, max_position_embeddings=2048, base=10000)
    cos, sin = rope(x, position_ids)
    cos = jax.block_until_ready(cos)
    sin = jax.block_until_ready(sin)

    ref_cos, ref_sin = reference_rotary(DIM, 10000.0, x, position_ids)
    assert cos.shape == (B, S, DIM) and sin.shape == (B, S, DIM)
    assert cos.dtype == x.dtype and sin.dtype == x.dtype
    assert jnp.allclose(cos, ref_cos, atol=1e-5, rtol=1e-5)
    assert jnp.allclose(sin, ref_sin, atol=1e-5, rtol=1e-5)

    # Larger, tiled, bf16 path (exercises the (batch, seq_tiles) grid and the
    # lane-dense dim=256 output layout typical of real Gemma head_dim).
    B2, S2, DIM2 = 2, 1024, 256
    x2 = jnp.zeros((B2, S2, 8), jnp.bfloat16)
    pos2 = jnp.broadcast_to(jnp.arange(S2, dtype=jnp.int32)[None, :], (B2, S2))
    rope2 = GemmaRotaryEmbeddingPallas(DIM2, max_position_embeddings=4096)
    cos2, sin2 = rope2(x2, pos2)
    cos2 = jax.block_until_ready(cos2)
    sin2 = jax.block_until_ready(sin2)
    rc2, rs2 = reference_rotary(DIM2, 10000.0, x2, pos2)
    assert cos2.shape == (B2, S2, DIM2) and cos2.dtype == jnp.bfloat16
    assert jnp.allclose(cos2.astype(jnp.float32), rc2.astype(jnp.float32),
                        atol=2e-2, rtol=2e-2)
    assert jnp.allclose(sin2.astype(jnp.float32), rs2.astype(jnp.float32),
                        atol=2e-2, rtol=2e-2)

    print("KERNEL_OK")
</pallas_src>

<mosaic_0001>
module attributes {stable_mosaic.version = 11 : i64} {
  func.func @_rotary_cos_sin_kernel(%arg0: i32, %arg1: i32, %arg2: memref<1x8x1xf32, #tpu.memory_space<vmem>>, %arg3: memref<1x16xf32, #tpu.memory_space<vmem>>, %arg4: memref<1x8x16xf32, #tpu.memory_space<vmem>>, %arg5: memref<1x8x16xf32, #tpu.memory_space<vmem>>) attributes {dimension_semantics = [#tpu.dimension_semantics<parallel>, #tpu.dimension_semantics<parallel>], iteration_bounds = array<i64: 2, 1>, scalar_prefetch = 0 : i64, scratch_operands = 0 : i64, tpu.core_type = #tpu.core_type<tc>, window_params = [{transform_indices = @transform_0, window_bounds = array<i64: 1, 8, 1>}, {pipeline_mode = #tpu.pipeline_mode<synchronous>, transform_indices = @transform_1, window_bounds = array<i64: 1, 16>}, {transform_indices = @transform_2, window_bounds = array<i64: 1, 8, 16>}, {transform_indices = @transform_3, window_bounds = array<i64: 1, 8, 16>}]} {
    %c0 = arith.constant 0 : index
    %c0_0 = arith.constant 0 : index
    %c0_1 = arith.constant 0 : index
    %0 = vector.load %arg2[%c0, %c0_0, %c0_1] : memref<1x8x1xf32, #tpu.memory_space<vmem>>, vector<1x8x1xf32>
    %c0_2 = arith.constant 0 : index
    %c0_3 = arith.constant 0 : index
    %1 = vector.load %arg3[%c0_2, %c0_3] : memref<1x16xf32, #tpu.memory_space<vmem>>, vector<1x16xf32>
    %2 = vector.shape_cast %1 : vector<1x16xf32> to vector<1x1x16xf32>
    %3 = vector.broadcast %0 : vector<1x8x1xf32> to vector<1x8x16xf32>
    %4 = vector.broadcast %2 : vector<1x1x16xf32> to vector<1x8x16xf32>
    %5 = arith.mulf %3, %4 : vector<1x8x16xf32>
    %6 = math.cos %5 : vector<1x8x16xf32>
    %c0_4 = arith.constant 0 : index
    %c0_5 = arith.constant 0 : index
    %c0_6 = arith.constant 0 : index
    %7 = vector.load %arg4[%c0_4, %c0_5, %c0_6] : memref<1x8x16xf32, #tpu.memory_space<vmem>>, vector<1x8x16xf32>
    tpu.vector_store %arg4[%c0_4, %c0_5, %c0_6], %6 {strides = array<i32>} : memref<1x8x16xf32, #tpu.memory_space<vmem>>, vector<1x8x16xf32>,
    %8 = math.sin %5 : vector<1x8x16xf32>
    %c0_7 = arith.constant 0 : index
    %c0_8 = arith.constant 0 : index
    %c0_9 = arith.constant 0 : index
    %9 = vector.load %arg5[%c0_7, %c0_8, %c0_9] : memref<1x8x16xf32, #tpu.memory_space<vmem>>, vector<1x8x16xf32>
    tpu.vector_store %arg5[%c0_7, %c0_8, %c0_9], %8 {strides = array<i32>} : memref<1x8x16xf32, #tpu.memory_space<vmem>>, vector<1x8x16xf32>,
    return
  }
  func.func @transform_0(%arg0: i32, %arg1: i32) -> (i32, i32, i32) {
    %c0_i32 = arith.constant 0 : i32
    %c0_i32_0 = arith.constant 0 : i32
    return %arg0, %arg1, %c0_i32 : i32, i32, i32
  }
  func.func @transform_1(%arg0: i32, %arg1: i32) -> (i32, i32) {
    %c0_i32 = arith.constant 0 : i32
    %c0_i32_0 = arith.constant 0 : i32
    %c0_i32_1 = arith.constant 0 : i32
    return %c0_i32, %c0_i32_0 : i32, i32
  }
  func.func @transform_2(%arg0: i32, %arg1: i32) -> (i32, i32, i32) {
    %c0_i32 = arith.constant 0 : i32
    %c0_i32_0 = arith.constant 0 : i32
    return %arg0, %arg1, %c0_i32 : i32, i32, i32
  }
  func.func @transform_3(%arg0: i32, %arg1: i32) -> (i32, i32, i32) {
    %c0_i32 = arith.constant 0 : i32
    %c0_i32_0 = arith.constant 0 : i32
    return %arg0, %arg1, %c0_i32 : i32, i32, i32
  }
}

</mosaic_0001>

<bundles_post_ra>
// kernel: tpu_custom_call.1
= control target key start
LH: loop header
LB: loop body
LE: loop exit
PB: predicated region body
PF: predicated region fallthrough
CT: control target
= control target key end

     0   :  { %9 = vsyncpa [#allocation3], 0  ;;  %s1090_s0 = inlined_call_operand.vmem [shape: f32[2,8,1], index: 0, kind: input, shape index: {}]   ;;  %s1091_s1 = inlined_call_operand.vmem [shape: f32[1,16], index: 1, kind: input, shape index: {}]   ;;  %s1092_s2 = inlined_call_operand.hbm [shape: f32[2,8,16], index: 2, kind: output, shape index: {0}]   ;;  %s1093_s3 = inlined_call_operand.hbm [shape: f32[2,8,16], index: 3, kind: output, shape index: {1}]  }
   0x1   :  { %11 = vsyncpa [#allocation3 + $0x1], 0 }
   0x2   :  { %12 = vsyncpa [#allocation5], 0 }
   0x3   :  { %14 = vsyncpa [#allocation5 + $0x1], 0  ;;  %s897_s12 = smov 0   ;;  %s899_s13 = smov 0  }
   0x4   :  { %s901_s14 = smov 0   ;;  %s903_s15 = smov 0  }
   0x5   :  { %s905_s16 = smov 0   ;;  %s907_s17 = smov 0  }
   0x6 LB: > { %s669_s18 = sadd.s32 4294967295, %s868_s17   ;;  %s670_s19 = sadd.s32 4294967294, %s868_s17   ;;  %s868_s17 = sphi %s907_s17, %s20_s17   ;;  %s864_s16 = sphi %s905_s16, %s1100_s16   ;;  %s860_s15 = sphi %s903_s15, %s1099_s15   ;;  %s856_s14 = sphi %s901_s14, %s1098_s14   ;;  %s852_s13 = sphi %s899_s13, %s1097_s13   ;;  %s848_s12 = sphi %s897_s12, %s1096_s12  }
   0x7   : > { %s32_s20 = sadd.s32 1, %s864_s16  ;;  %s90_s21 = sadd.s32 1, %s856_s14 }
   0x8   : > { %p34_p0 = scmp.ge.s32.totalorder %s32_s20, 2  ;;  %p100_p1 = scmp.ne.s32.totalorder %s856_s14, %s852_s13 }
   0x9   : > { %p101_p2 = scmp.eq.s32.totalorder %s669_s18, 1  ;;  %p106_p3 = scmp.ne.s32.totalorder %s852_s13, %s848_s12 }
   0xa   : > { %s1102_s20 = smov (%p34_p0, %s32_s20), 0  ;;  %p107_p5 = scmp.eq.s32.totalorder %s670_s19, 1 }
   0xb   : > { %p937_p4 = por %p101_p2, %p100_p1  ;;  %s85_s23 = ssub.s32 %s864_s16, %s1102_s20 }
   0xc   : > { %p673_p6 = scmp.ge.s32.totalorder %s868_s17, 1  ;;  %p88_p7 = scmp.eq.s32.totalorder %s85_s23, 0 }
   0xd   : > { %p944_p8 = por %p107_p5, %p106_p3  ;;  %p166_p9 = scmp.lt.s32.totalorder %s868_s17, 3 }
   0xe   : > { %s950_s25 = scalar_select %p88_p7, %s856_s14, %s90_s21  }
   0xf   : > { %p167_p10 = pnand %p673_p6, %p166_p9 }
  0x10   : > { %p197_p11 = scmp.lt.s32.totalorder (!%p167_p10), %s860_s15, 1  ;;  %s1021_s6 = sand.u32 (!%p167_p10), 1, %s852_s13  }
  0x11   : > { %170 = sbr.rel (%p167_p10) target bundleno = 255 (0xff), region = 28  ;;  %s674_s7 = sshll.u32 (!%p167_p10), %s1021_s6, 3 }
  0x12   : > { %s685_s8 = sshll.u32 (!%p167_p10), %s860_s15, 3  ;;  %s189_s23 = scalar_lea.vmem (!%p167_p10), [#allocation2], %s674_s7 }
  0x13   : > { %s544_s11 = scalar_lea.hbm (!%p167_p10), %s1092_s2, %s685_s8  ;;  %s559_s21 = scalar_lea.hbm (!%p167_p10), %s1093_s3, %s685_s8 }
  0x14   : > { %s563_s29 = sshll.u32 (!%p167_p10), %s559_s21, 4  ;;  %s778_s9 = scalar_lea.hbm (!%p167_p10), %s1092_s2, 16  ;;  %s1038_s29 = int_to_ptr.hbm [resolvable:$true] %s563_s29 }
  0x16   : > { %v870_v0 = vmov 0   ;;  %s198_s26 = scalar_select %p197_p11, %s860_s15, 1  ;;  %v757_v2 = vld [vmem:[%s1091_s1] ss:$0 sm:$0xff]  ;;  %v871_v16 = vmov 683565275  }
  0x17   : > { %756 = vset.pattern.permute.xlu0 %v870_v0  ;;  %v872_v18 = vmov 2475754826   ;;  %v873_v21 = vmov 2131351028   ;;  %v874_v24 = vmov 2102212464  }
  0x18   : > { %s676_s27 = sshll.u32 %s198_s26, 3  ;;  %v875_v27 = vmov 920167782   ;;  %v876_v30 = vmov 1326507024   ;;  %s546_s26 = sshll.u32 %s189_s23, 4  ;;  %s547_s26 = int_to_ptr.vmem [resolvable:$true] %s546_s26 }
  0x19   : > { %s203_s30 = scalar_lea.vmem %s1090_s0, %s676_s27  ;;  %s548_s15 = sshll.u32 %s544_s11, 4  ;;  %s549_s15 = int_to_ptr.hbm [resolvable:$true] %s548_s15 }
  0x1a   : > { %v204_v1 = vld [vmem:[%s203_s30] sm:$0xff]  ;;  %s1031_s27 = scalar_lea.vmem [#allocation4], %s674_s7  ;;  %s528_s30 = scalar_lea.sflag [#allocation3], %s1021_s6 }
  0x1b   : > { %208 = vperm.xlu0 %756, %v204_v1   ;;  %s561_s28 = sshll.u32 %s1031_s27, 4  ;;  %s772_s4 = sshra.s32 %s549_s15, 4  ;;  %s1036_s28 = int_to_ptr.vmem [resolvable:$true] %s561_s28  ;;  %s773_s4 = int_to_ptr.hbm [resolvable:$true] %s772_s4 }
  0x1c   : > { %s774_s5 = scalar_lea.hbm %s773_s4, 8  ;;  %p779_p1 = scmp.lt.s32.totalorder %s773_s4, %s1092_s2 }
  0x1d   : > { %p775_p12 = scmp.ne.s32.totalorder %s773_s4, %s774_s5  ;;  %p780_p2 = scmp.lt.s32.totalorder %s778_s9, %s774_s5 }
  0x1f   : > { %p776_p13 = pnand %p775_p12, %p937_p4  ;;  %p781_p3 = por %p780_p2, %p779_p1 }
  0x21   : > { %p777_p0 = pneg %p776_p13 }
  0x23   : > { %p782_p5 = pnand %p781_p3, %p777_p0 }
  0x8d   : > { %v209_v3 = vpop.permute.xlu0 %208 }
  0x8e   : > { %v961_v4 = vmul.f32 %v757_v2, %v209_v3 }
  0x90   : > { %v218_v5 = vand.u32 2139095040, %v961_v4  ;;  %v215_v8 = vand.u32 2147483647, %v961_v4  ;;  %vm217_vm12 = vcmp.lt.s32.totalorder %v961_v4, 0 }
  0x92   : > { %v219_v6 = vshrl.u32 %v218_v5, 23  ;;  %v222_v10 = vand.u32 8388607, %v215_v8  ;;  %vm216_vm13 = vcmp.le.f32.partialorder %v215_v8, 0.7853982 }
  0x94   : > { %v677_v7 = vadd.s32 4294967169, %v219_v6  ;;  %v223_v14 = vor.u32 8388608, %v222_v10 }
  0x96   : > { %v225_v9 = vadd.s32 1, %v677_v7  ;;  %v978_v37 = vshll.u32 %v223_v14, 8 }
  0x98   : > { %vm226_vm0 = vcmp.gt.s32.totalorder %v225_v9, 0  ;;  %v264_v46 = vand.u32 65535, %v978_v37  ;;  %v265_v47 = vshrl.u32 %v978_v37, 16 }
  0x99   : > { %v227_v11 = vsel %vm226_vm0, %v225_v9, 0 }
  0x9a   : > { %v229_v12 = vand.u32 31, %v227_v11  ;;  %v969_v15 = vshrl.u32 %v227_v11, 5 }
  0x9c   : > { %v967_v13 = vsub.s32 32, %v229_v12  ;;  %v232_v17 = vshll.u32 %v871_v16, %v229_v12  ;;  %v235_v19 = vshll.u32 %v872_v18, %v229_v12  ;;  %v238_v23 = vshll.u32 %v873_v21, %v229_v12 }
  0x9d   : > { %v241_v26 = vshll.u32 %v874_v24, %v229_v12  ;;  %v244_v29 = vshll.u32 %v875_v27, %v229_v12  ;;  %vm247_vm1 = vcmp.lt.s32.totalorder %v969_v15, 1  ;;  %vm250_vm2 = vcmp.lt.s32.totalorder %v969_v15, 4 }
  0x9e   : > { %v233_v20 = vshrl.u32 %v872_v18, %v967_v13  ;;  %v236_v22 = vshrl.u32 %v873_v21, %v967_v13  ;;  %v239_v25 = vshrl.u32 %v874_v24, %v967_v13  ;;  %v242_v28 = vshrl.u32 %v875_v27, %v967_v13 }
  0x9f   : > { %v245_v31 = vshrl.u32 %v876_v30, %v967_v13  ;;  %vm249_vm3 = vcmp.lt.s32.totalorder %v969_v15, 3  ;;  %vm248_vm4 = vcmp.lt.s32.totalorder %v969_v15, 2  ;;  %v231_v11 = vshrl.u32 %v871_v16, %v967_v13 }
  0xa0   : > { %v234_v32 = vor.u32 %v233_v20, %v232_v17  ;;  %v237_v33 = vor.u32 %v236_v22, %v235_v19  ;;  %v240_v34 = vor.u32 %v239_v25, %v238_v23  ;;  %v243_v35 = vor.u32 %v242_v28, %v241_v26 }
  0xa1   : > { %v246_v36 = vor.u32 %v245_v31, %v244_v29 }
  0xa2   : > { %v255_v38 = vsel %vm247_vm1, %v234_v32, %v237_v33  ;;  %v259_v39 = vsel %vm247_vm1, %v237_v33, %v240_v34  ;;  %v256_v40 = vsel %vm250_vm2, %v243_v35, 920167782  ;;  %v252_v7 = vsel %vm250_vm2, %v240_v34, 2102212464 }
  0xa3   : > { %v260_v41 = vsel %vm250_vm2, %v246_v36, 1326507024  ;;  %v257_v42 = vsel %vm249_vm3, %v240_v34, %v256_v40  ;;  %v251_v20 = vsel %vm247_vm1, %v231_v11, %v234_v32  ;;  %v253_v21 = vsel %vm249_vm3, %v237_v33, %v252_v7 }
  0xa4   : > { %v261_v43 = vsel %vm249_vm3, %v243_v35, %v260_v41  ;;  %v258_v44 = vsel %vm248_vm4, %v255_v38, %v257_v42  ;;  %v254_v13 = vsel %vm248_vm4, %v251_v20, %v253_v21  ;;  %vm369_vm1 = vcmask 130048  }
  0xa5   : > { %v262_v45 = vsel %vm248_vm4, %v259_v39, %v261_v43  ;;  %v288_v50 = vand.u32 65535, %v258_v44  ;;  %v289_v51 = vshrl.u32 %v258_v44, 16  ;;  %v308_v28 = vmul.u32 %v978_v37, %v254_v13 }
  0xa6   : > { %v266_v48 = vand.u32 65535, %v262_v45  ;;  %v267_v49 = vshrl.u32 %v262_v45, 16 }
  0xa7   : > { %v291_v54 = vmul.u32 %v289_v51, %v264_v46  ;;  %v292_v55 = vmul.u32 %v288_v50, %v265_v47  ;;  %v290_v59 = vmul.u32 %v288_v50, %v264_v46  ;;  %v293_v63 = vmul.u32 %v289_v51, %v265_v47 }
  0xa8   : > { %v269_v52 = vmul.u32 %v267_v49, %v264_v46  ;;  %v270_v53 = vmul.u32 %v266_v48, %v265_v47  ;;  %v268_v56 = vmul.u32 %v266_v48, %v264_v46  ;;  %v271_v58 = vmul.u32 %v267_v49, %v265_v47 }
  0xa9   : > { %v294_v60 = vshll.u32 %v291_v54, 16  ;;  %v296_v2 = vshll.u32 %v292_v55, 16  ;;  %v295_v18 = vshrl.u32 %v291_v54, 16  ;;  %v297_v24 = vshrl.u32 %v292_v55, 16 }
  0xaa   : > { %v272_v57 = vshll.u32 %v269_v52, 16  ;;  %v274_v61 = vshll.u32 %v270_v53, 16  ;;  %v273_v12 = vshrl.u32 %v269_v52, 16  ;;  %v275_v22 = vshrl.u32 %v270_v53, 16 }
  0xab   : > { %vm298_vm6 = vc.u32 %v290_v59, %v294_v60  ;;  %v300_v3 = vadd.s32 %v294_v60, %v290_v59 }
  0xac   : > { %vm276_vm5 = vc.u32 %v268_v56, %v272_v57  ;;  %v278_v62 = vadd.s32 %v272_v57, %v268_v56  ;;  %v299_v6 = vsel %vm298_vm6, 1, %v870_v0 }
  0xad   : > { %v277_v1 = vsel %vm276_vm5, 1, %v870_v0  ;;  %v301_v10 = vadd.s32 %v299_v6, %v293_v63  ;;  %vm302_vm8 = vc.u32 %v300_v3, %v296_v2  ;;  %v304_v27 = vadd.s32 %v300_v3, %v296_v2 }
  0xae   : > { %v279_v5 = vadd.s32 %v277_v1, %v271_v58  ;;  %vm280_vm7 = vc.u32 %v278_v62, %v274_v61  ;;  %v303_v17 = vsel %vm302_vm8, 1, %v870_v0  ;;  %vm358_vm5 = vweird.f32 %v961_v4 }
  0xaf   : > { %v281_v9 = vsel %vm280_vm7, 1, %v870_v0  ;;  %v305_v19 = vadd.s32 %v303_v17, %v301_v10 }
  0xb0   : > { %v283_v14 = vadd.s32 %v281_v9, %v279_v5 }
  0xb1   : > { %v306_v25 = vadd.s32 %v305_v19, %v295_v18 }
  0xb2   : > { %v284_v23 = vadd.s32 %v283_v14, %v273_v12 }
  0xb3   : > { %v307_v16 = vadd.s32 %v306_v25, %v297_v24 }
  0xb4   : > { %v285_v26 = vadd.s32 %v284_v23, %v275_v22 }
  0xb5   : > { %v311_v0 = vadd.s32 1, %v307_v16 }
  0xb6   : > { %vm310_vm9 = vc.u32 %v285_v26, %v304_v27  ;;  %v309_v15 = vadd.s32 %v304_v27, %v285_v26 }
  0xb7   : > { %v312_v29 = vsel %vm310_vm9, %v311_v0, %v307_v16 }
  0xb8   : > { %v313_v30 = vadd.s32 %v312_v29, %v308_v28 }
  0xba   : > { %v314_v31 = vadd.s32 536870912, %v313_v30 }
  0xbc   : > { %v315_v32 = vshrl.u32 %v314_v31, 30 }
  0xbe   : > { %v316_v34 = vshll.u32 %v315_v32, 30  ;;  %v339_v53 = vsub.s32 4, %v315_v32 }
  0xc0   : > { %v317_v33 = vsub.s32 %v313_v30, %v316_v34  ;;  %v340_v58 = vsel %vm217_vm12, %v339_v53, %v315_v32 }
  0xc1   : > { %v342_v61 = vsel %vm216_vm13, 0, %v340_v58 }
  0xc2   : > { %vm318_vm10 = vcmp.lt.s32.totalorder %v317_v33, 0  ;;  %v319_v35 = vsub.s32 0, %v317_v33  ;;  %v515_v8 = vadd.s32 3, %v342_v61  ;;  %v359_v9 = vand.u32 3, %v342_v61 }
  0xc4   : > { %v320_v36 = vsel %vm318_vm10, %v319_v35, %v317_v33  ;;  %v516_v10 = vand.u32 3, %v515_v8  ;;  %vm360_vm14 = vcmp.lt.s32.totalorder %v359_v9, 2  ;;  %vm361_vm15 = vcmp.eq.s32.totalorder %v359_v9, 0 }
  0xc5   : > { %v321_v38 = vclz %v320_v36  ;;  %vm364_vm0 = vcmp.eq.s32.totalorder %v359_v9, 2 }
  0xc6   : > { %vm517_vm2 = vcmp.lt.s32.totalorder %v516_v10, 2  ;;  %vm518_vm3 = vcmp.eq.s32.totalorder %v516_v10, 0  ;;  %vm521_vm4 = vcmp.eq.s32.totalorder %v516_v10, 2 }
  0xc7   : > { %v678_v39 = vadd.s32 4294967294, %v321_v38 }
  0xc9   : > { %vm679_vm11 = vcmp.lt.s32.totalorder %v678_v39, 0 }
  0xca   : > { %v324_v40 = vsel %vm679_vm11, 0, %v678_v39 }
  0xcb   : > { %v325_v41 = vsub.s32 32, %v324_v40  ;;  %v329_v42 = vsub.s32 4294967266, %v324_v40  ;;  %v326_v43 = vshll.u32 %v317_v33, %v324_v40 }
  0xcd   : > { %v327_v44 = vshrl.u32 %v309_v15, %v325_v41  ;;  %v330_v45 = vadd.s32 127, %v329_v42 }
  0xcf   : > { %v328_v37 = vor.u32 %v327_v44, %v326_v43  ;;  %v331_v46 = vshll.u32 %v330_v45, 23 }
  0xd1   : > { %v332_v47 = vor.u32 4788187, %v331_v46  ;;  %v335_v49 = vcvt.s32.f32 %v328_v37 }
  0xd3   : > { %v333_v48 = vand.u32 2147483647, %v332_v47 }
  0xd5   : > { %v336_v50 = vmul.f32 %v335_v49, %v333_v48 }
  0xd7   : > { %v337_v51 = vxor.u32 2147483648, %v336_v50 }
  0xd9   : > { %v338_v52 = vsel %vm217_vm12, %v337_v51, %v336_v50 }
  0xda   : > { %v341_v54 = vsel %vm216_vm13, %v961_v4, %v338_v52 }
  0xdb   : > { %v343_v55 = vmul.f32 %v341_v54, %v341_v54 }
  0xdd   : > { %v344_v56 = vmul.f32 -0.001358992, %v343_v55  ;;  %v351_v57 = vmul.f32 -0.00019511016, %v343_v55 }
  0xdf   : > { %v345_v59 = vadd.f32 0.041655596, %v344_v56  ;;  %v352_v60 = vadd.f32 0.008332121, %v351_v57 }
  0xe1   : > { %v346_v62 = vmul.f32 %v345_v59, %v343_v55  ;;  %v353_v63 = vmul.f32 %v352_v60, %v343_v55 }
  0xe3   : > { %v347_v1 = vadd.f32 -0.4999988, %v346_v62  ;;  %v354_v2 = vadd.f32 -0.16666654, %v353_v63 }
  0xe5   : > { %v348_v3 = vmul.f32 %v347_v1, %v343_v55  ;;  %v355_v5 = vmul.f32 %v354_v2, %v343_v55 }
  0xe7   : > { %v349_v6 = vadd.f32 1.0, %v348_v3  ;;  %v356_v7 = vadd.f32 1.0, %v355_v5 }
  0xe9   : > { %v357_v11 = vmul.f32 %v356_v7, %v341_v54  ;;  %v365_v12 = vxor.u32 2147483648, %v349_v6 }
  0xeb   : > { %v362_v14 = vxor.u32 2147483648, %v357_v11  ;;  %v366_v18 = vsel %vm364_vm0, %v365_v12, %v357_v11  ;;  %v523_v20 = vsel %vm521_vm4, %v365_v12, %v357_v11 }
  0xed   : > { %v363_v17 = vsel %vm361_vm15, %v349_v6, %v362_v14  ;;  %v520_v19 = vsel %vm518_vm3, %v349_v6, %v362_v14 }
  0xee   : > { %v367_v21 = vsel %vm360_vm14, %v363_v17, %v366_v18  ;;  %v524_v22 = vsel %vm517_vm2, %v520_v19, %v523_v20 }
  0xef   : > { %v368_v23 = vsel %vm358_vm5, nan, %v367_v21  ;;  %v525_v24 = vsel %vm358_vm5, nan, %v524_v22 }
  0xf0   : > { %370 = vst.msk [vmem:[%s189_s23] sm:$0xff] %vm369_vm1, %v368_v23 }
  0xf1   : > { %785 = shalt.err (!%p782_p5)
}
  0xf2   : > { %689 = dma.vmem_to_hbm [thread:$0]  (%p937_p4), %s547_s26, 128, %s549_s15, %s528_s30   ;;  %526 = vst.msk [vmem:[%s1031_s27] sm:$0xff] %vm369_vm1, %v525_v24 }
  0xf3   : > { %s533_s18 = scalar_lea.sflag [#allocation5], %s1021_s6  ;;  %s800_s19 = sshra.s32 %s1038_s29, 4  ;;  %s801_s19 = int_to_ptr.hbm [resolvable:$true] %s800_s19 }
  0xf4   : > { %s802_s21 = scalar_lea.hbm %s801_s19, 8  ;;  %s806_s5 = scalar_lea.hbm %s1093_s3, 16 }
  0xf5   : > { %p803_p6 = scmp.ne.s32.totalorder %s801_s19, %s802_s21  ;;  %p807_p10 = scmp.lt.s32.totalorder %s801_s19, %s1093_s3 }
  0xf6   : > { %p808_p11 = scmp.lt.s32.totalorder %s806_s5, %s802_s21 }
  0xf7   : > { %p804_p7 = pnand %p803_p6, %p937_p4 }
  0xf8   : > { %p809_p12 = por %p808_p11, %p807_p10 }
  0xf9   : > { %p805_p9 = pneg %p804_p7 }
  0xfb   : > { %p810_p13 = pnand %p809_p12, %p805_p9 }
  0xfd   : > { %813 = shalt.err (!%p810_p13)
}
  0xfe   : > { %690 = dma.vmem_to_hbm [thread:$0]  (%p937_p4), %s1036_s28, 128, %s1038_s29, %s533_s18  }
  0xff PF: > { %p700_p0 = scmp.ge.s32.totalorder %s868_s17, 2  ;;  %s575_s6 = sand.u32 1, %s848_s12  }
 0x100   : > { %s576_s26 = scalar_lea.sflag [#allocation3], %s575_s6 }
 0x101   : > { %p694_p1 = pnand %p700_p0, %p944_p8 }
 0x103   : > { %p695_p2 = pneg %p694_p1 }
 0x105   : > { %839 = dma.done.wait (%p695_p2), %s576_s26, 128  }
 0x106   : > { %841 = vsyncadd (%p695_p2), %s576_s26, 4294967168  ;;  %s586_s15 = scalar_lea.sflag [#allocation5], %s575_s6 }
 0x107   : > { %843 = dma.done.wait (%p695_p2), %s586_s15, 128  }
 0x108   : > { %845 = vsyncadd (%p695_p2), %s586_s15, 4294967168  ;;  %s20_s17 = sadd.s32 1, %s868_s17   ;;  %s1096_s12 = smov %s852_s13 }
 0x109   : > { %p17_p3 = scmp.ge.s32.totalorder %s20_s17, 4   ;;  %s1097_s13 = smov %s856_s14 }
 0x10a   : > { %s1098_s14 = smov %s950_s25  ;;  %s1099_s15 = smov %s864_s16 }
 0x10b   : > { %s1100_s16 = smov %s1102_s20  ;;  %19 = sbr.rel (!%p17_p3) target bundleno = 6 (0x6), region = 80 }
 0x110   :  { %592 = vsyncpa [#allocation3], 1 }
 0x111   :  { %594 = vsyncpa [#allocation3 + $0x1], 1 }
 0x112   :  { %595 = vsyncpa [#allocation5], 1 }
 0x113   :  { %597 = vsyncpa [#allocation5 + $0x1], 1 }

</bundles_post_ra>
